<compile_context>
chip_gen: v7x
topology: tpu7x:2x2x1
jax: 0.10.0
libtpu: 0.0.40
codegen_flags: <defaults>
</compile_context>

<pallas_src>
import functools

import jax
import jax.numpy as jnp
from jax.experimental import pallas as pl
from jax.experimental.pallas import tpu as pltpu


def _shaping_kernel(k_ref, s_ref, s2_ref, w1b1_ref, w2b2_ref, fk_ref, fk2_ref):
    """One batch block: two fused 2-layer MLPs + in-kernel k-column select.

    k_ref:   (1,) int32 in SMEM (scalar prefetch)
    s_ref:   (block_b, input_size)   state block
    s2_ref:  (block_b, input_size)   state_ block
    w1b1_ref:(input_size + 1, hidden)  [w1 ; b1]
    w2b2_ref:(hidden + 1, k_max)       [w2 ; b2]
    fk_ref / fk2_ref: (block_b, 1) selected column outputs
    """
    in_dim = w1b1_ref.shape[0] - 1
    hid = w2b2_ref.shape[0] - 1

    w1 = w1b1_ref[:in_dim, :]       # (in, hid)
    b1 = w1b1_ref[in_dim:, :]       # (1, hid)   broadcast row
    w2 = w2b2_ref[:hid, :]          # (hid, k_max)
    b2 = w2b2_ref[hid:, :]          # (1, k_max) broadcast row
    k = k_ref[0]                    # SMEM scalar

    def head(x):
        h = jnp.tanh(jnp.dot(x, w1, preferred_element_type=jnp.float32) + b1)
        logits = jnp.dot(h, w2, preferred_element_type=jnp.float32) + b2
        lane = jax.lax.broadcasted_iota(jnp.int32, logits.shape, 1)
        # One-hot select of column k (avoids dynamic lane slicing).
        return jnp.sum(jnp.where(lane == k, logits, 0.0), axis=-1, keepdims=True)

    fk_ref[...] = head(s_ref[...]).astype(fk_ref.dtype)
    fk2_ref[...] = head(s2_ref[...]).astype(fk2_ref.dtype)


def prepare_params(params):
    """Fold biases into the weight matrices (call once, outside the hot loop)."""
    w1b1 = jnp.concatenate([params["w1"], params["b1"].reshape(1, -1)], axis=0)
    w2b2 = jnp.concatenate([params["w2"], params["b2"].reshape(1, -1)], axis=0)
    return w1b1, w2b2


def _round_up(x, m):
    return (x + m - 1) // m * m


@functools.partial(jax.jit, static_argnames=("block_b",))
def _shaping_call(state, state_, k_arr, w1b1, w2b2, *, block_b):
    B, input_size = state.shape
    hidden = w1b1.shape[1]
    k_max = w2b2.shape[1]

    B_pad = _round_up(B, block_b)
    if B_pad != B:
        pad = ((0, B_pad - B), (0, 0))
        state = jnp.pad(state, pad)
        state_ = jnp.pad(state_, pad)
    grid = (B_pad // block_b,)

    batch_spec = pl.BlockSpec((block_b, input_size), lambda i, kref: (i, 0))
    out_spec = pl.BlockSpec((block_b, 1), lambda i, kref: (i, 0))

    fk, fk_ = pl.pallas_call(
        _shaping_kernel,
        out_shape=(
            jax.ShapeDtypeStruct((B_pad, 1), jnp.float32),
            jax.ShapeDtypeStruct((B_pad, 1), jnp.float32),
        ),
        grid_spec=pltpu.PrefetchScalarGridSpec(
            num_scalar_prefetch=1,
            grid=grid,
            in_specs=[
                batch_spec,                                                # state
                batch_spec,                                                # state_
                pl.BlockSpec((input_size + 1, hidden), lambda i, kref: (0, 0)),
                pl.BlockSpec((hidden + 1, k_max), lambda i, kref: (0, 0)),
            ],
            out_specs=(out_spec, out_spec),
        ),
        compiler_params=pltpu.CompilerParams(
            dimension_semantics=("parallel",),
        ),
    )(k_arr, state, state_, w1b1, w2b2)

    return fk[:B, 0], fk_[:B, 0]


def shaping_forward(state, state_, k, params, *, max_block_b=512):
    """Pallas-backed forward of `Shaping`. Returns (f_k, f_k_), each (B,)."""
    w1b1, w2b2 = prepare_params(params)   # cheap; hoist by calling prepare_params yourself
    B = state.shape[0]
    block_b = min(max_block_b, _round_up(B, 8))
    k_arr = jnp.atleast_1d(jnp.asarray(k, dtype=jnp.int32))
    return _shaping_call(state, state_, k_arr, w1b1, w2b2, block_b=block_b)


def init_params(key, input_size, hidden_size, k_max):
    """Deterministic synthetic parameters (weights stored as (in, out))."""
    k1, k2, k3, k4 = jax.random.split(key, 4)
    w1 = jax.random.normal(k1, (input_size, hidden_size), jnp.float32) * 0.1
    b1 = jax.random.normal(k2, (hidden_size,), jnp.float32) * 0.1
    w2 = jax.random.normal(k3, (hidden_size, k_max), jnp.float32) * 0.1
    b2 = jax.random.normal(k4, (k_max,), jnp.float32) * 0.1
    return {"w1": w1, "b1": b1, "w2": w2, "b2": b2}


if __name__ == "__main__":
    batch = 2
    input_size = 32
    hidden_size = 32
    k_max = 8
    k = 3

    key = jax.random.PRNGKey(0)
    pkey, skey, skey_ = jax.random.split(key, 3)
    params = init_params(pkey, input_size, hidden_size, k_max)
    state = jax.random.normal(skey, (batch, input_size), jnp.float32)
    state_ = jax.random.normal(skey_, (batch, input_size), jnp.float32)

    f_k, f_k_ = shaping_forward(state, state_, k, params)
    jax.block_until_ready((f_k, f_k_))

    # Pure-JAX reference.
    def ref(x):
        h = jnp.tanh(x @ params["w1"] + params["b1"])
        return (h @ params["w2"] + params["b2"])[:, k]

    assert f_k.shape == (batch,) and f_k_.shape == (batch,)
    assert jnp.allclose(f_k, ref(state), atol=1e-5)
    assert jnp.allclose(f_k_, ref(state_), atol=1e-5)

    # Larger batch exercises the multi-block grid + padding path (block_b=512, grid=3).
    big_b = 1029
    kb1, kb2 = jax.random.split(jax.random.PRNGKey(1))
    big_s = jax.random.normal(kb1, (big_b, input_size), jnp.float32)
    big_s_ = jax.random.normal(kb2, (big_b, input_size), jnp.float32)
    g_k, g_k_ = shaping_forward(big_s, big_s_, k, params)
    jax.block_until_ready((g_k, g_k_))
    assert g_k.shape == (big_b,) and g_k_.shape == (big_b,)
    assert jnp.allclose(g_k, ref(big_s), atol=1e-4)
    assert jnp.allclose(g_k_, ref(big_s_), atol=1e-4)

    print("KERNEL_OK")
</pallas_src>

<mosaic_0001>
module attributes {stable_mosaic.version = 11 : i64} {
  func.func @_shaping_kernel(%arg0: i32, %arg1: memref<1xi32, #tpu.memory_space<smem>>, %arg2: memref<8x32xf32, #tpu.memory_space<vmem>>, %arg3: memref<8x32xf32, #tpu.memory_space<vmem>>, %arg4: memref<33x32xf32, #tpu.memory_space<vmem>>, %arg5: memref<33x8xf32, #tpu.memory_space<vmem>>, %arg6: memref<8x1xf32, #tpu.memory_space<vmem>>, %arg7: memref<8x1xf32, #tpu.memory_space<vmem>>) attributes {dimension_semantics = [#tpu.dimension_semantics<parallel>], iteration_bounds = array<i64: 1>, scalar_prefetch = 1 : i64, scratch_operands = 0 : i64, tpu.core_type = #tpu.core_type<tc>, window_params = [{transform_indices = @transform_0, window_bounds = array<i64: 8, 32>}, {transform_indices = @transform_1, window_bounds = array<i64: 8, 32>}, {pipeline_mode = #tpu.pipeline_mode<synchronous>, transform_indices = @transform_2, window_bounds = array<i64: 33, 32>}, {pipeline_mode = #tpu.pipeline_mode<synchronous>, transform_indices = @transform_3, window_bounds = array<i64: 33, 8>}, {transform_indices = @transform_4, window_bounds = array<i64: 8, 1>}, {transform_indices = @transform_5, window_bounds = array<i64: 8, 1>}]} {
    %c0 = arith.constant 0 : index
    %c0_0 = arith.constant 0 : index
    %0 = vector.load %arg4[%c0, %c0_0] : memref<33x32xf32, #tpu.memory_space<vmem>>, vector<32x32xf32>
    %c32 = arith.constant 32 : index
    %c0_1 = arith.constant 0 : index
    %1 = vector.load %arg4[%c32, %c0_1] : memref<33x32xf32, #tpu.memory_space<vmem>>, vector<1x32xf32>
    %c0_2 = arith.constant 0 : index
    %c0_3 = arith.constant 0 : index
    %2 = vector.load %arg5[%c0_2, %c0_3] : memref<33x8xf32, #tpu.memory_space<vmem>>, vector<32x8xf32>
    %c32_4 = arith.constant 32 : index
    %c0_5 = arith.constant 0 : index
    %3 = vector.load %arg5[%c32_4, %c0_5] : memref<33x8xf32, #tpu.memory_space<vmem>>, vector<1x8xf32>
    %c0_6 = arith.constant 0 : index
    %4 = memref.load %arg1[%c0_6] : memref<1xi32, #tpu.memory_space<smem>>
    %c0_7 = arith.constant 0 : index
    %c0_8 = arith.constant 0 : index
    %5 = vector.load %arg2[%c0_7, %c0_8] : memref<8x32xf32, #tpu.memory_space<vmem>>, vector<8x32xf32>
    %cst = arith.constant dense<0.000000e+00> : vector<8x32xf32>
    %6 = tpu.matmul %5, %0, %cst {dimension_numbers = #tpu.dot_dimension_numbers<[1], [0], [0], [1], [0, 0, 1, 1], [], []>} : vector<8x32xf32>, vector<32x32xf32>, vector<8x32xf32> -> vector<8x32xf32>
    %7 = vector.broadcast %1 : vector<1x32xf32> to vector<8x32xf32>
    %8 = arith.addf %6, %7 : vector<8x32xf32>
    %9 = math.tanh %8 : vector<8x32xf32>
    %cst_9 = arith.constant dense<0.000000e+00> : vector<8x8xf32>
    %10 = tpu.matmul %9, %2, %cst_9 {dimension_numbers = #tpu.dot_dimension_numbers<[1], [0], [0], [1], [0, 0, 1, 1], [], []>} : vector<8x32xf32>, vector<32x8xf32>, vector<8x8xf32> -> vector<8x8xf32>
    %11 = vector.broadcast %3 : vector<1x8xf32> to vector<8x8xf32>
    %12 = arith.addf %10, %11 : vector<8x8xf32>
    %13 = tpu.iota {dimensions = array<i32: 1>} : vector<8x8xi32>
    %14 = vector.broadcast %4 : i32 to vector<8x8xi32>
    %15 = arith.cmpi eq, %13, %14 : vector<8x8xi32>
    %cst_10 = arith.constant 0.000000e+00 : f32
    %16 = vector.broadcast %cst_10 : f32 to vector<8x8xf32>
    %17 = arith.select %15, %12, %16 : vector<8x8xi1>, vector<8x8xf32>
    %cst_11 = arith.constant dense<0.000000e+00> : vector<8xf32>
    %18 = vector.multi_reduction <add>, %17, %cst_11 [1] : vector<8x8xf32> to vector<8xf32>
    %19 = vector.shape_cast %18 : vector<8xf32> to vector<8x1xf32>
    %c0_12 = arith.constant 0 : index
    %c0_13 = arith.constant 0 : index
    %20 = vector.load %arg6[%c0_12, %c0_13] : memref<8x1xf32, #tpu.memory_space<vmem>>, vector<8x1xf32>
    tpu.vector_store %arg6[%c0_12, %c0_13], %19 {strides = array<i32>} : memref<8x1xf32, #tpu.memory_space<vmem>>, vector<8x1xf32>,
    %c0_14 = arith.constant 0 : index
    %c0_15 = arith.constant 0 : index
    %21 = vector.load %arg3[%c0_14, %c0_15] : memref<8x32xf32, #tpu.memory_space<vmem>>, vector<8x32xf32>
    %cst_16 = arith.constant dense<0.000000e+00> : vector<8x32xf32>
    %22 = tpu.matmul %21, %0, %cst_16 {dimension_numbers = #tpu.dot_dimension_numbers<[1], [0], [0], [1], [0, 0, 1, 1], [], []>} : vector<8x32xf32>, vector<32x32xf32>, vector<8x32xf32> -> vector<8x32xf32>
    %23 = vector.broadcast %1 : vector<1x32xf32> to vector<8x32xf32>
    %24 = arith.addf %22, %23 : vector<8x32xf32>
    %25 = math.tanh %24 : vector<8x32xf32>
    %cst_17 = arith.constant dense<0.000000e+00> : vector<8x8xf32>
    %26 = tpu.matmul %25, %2, %cst_17 {dimension_numbers = #tpu.dot_dimension_numbers<[1], [0], [0], [1], [0, 0, 1, 1], [], []>} : vector<8x32xf32>, vector<32x8xf32>, vector<8x8xf32> -> vector<8x8xf32>
    %27 = vector.broadcast %3 : vector<1x8xf32> to vector<8x8xf32>
    %28 = arith.addf %26, %27 : vector<8x8xf32>
    %29 = tpu.iota {dimensions = array<i32: 1>} : vector<8x8xi32>
    %30 = vector.broadcast %4 : i32 to vector<8x8xi32>
    %31 = arith.cmpi eq, %29, %30 : vector<8x8xi32>
    %cst_18 = arith.constant 0.000000e+00 : f32
    %32 = vector.broadcast %cst_18 : f32 to vector<8x8xf32>
    %33 = arith.select %31, %28, %32 : vector<8x8xi1>, vector<8x8xf32>
    %cst_19 = arith.constant dense<0.000000e+00> : vector<8xf32>
    %34 = vector.multi_reduction <add>, %33, %cst_19 [1] : vector<8x8xf32> to vector<8xf32>
    %35 = vector.shape_cast %34 : vector<8xf32> to vector<8x1xf32>
    %c0_20 = arith.constant 0 : index
    %c0_21 = arith.constant 0 : index
    %36 = vector.load %arg7[%c0_20, %c0_21] : memref<8x1xf32, #tpu.memory_space<vmem>>, vector<8x1xf32>
    tpu.vector_store %arg7[%c0_20, %c0_21], %35 {strides = array<i32>} : memref<8x1xf32, #tpu.memory_space<vmem>>, vector<8x1xf32>,
    return
  }
  func.func @transform_0(%arg0: i32, %arg1: memref<1xi32, #tpu.memory_space<smem>>) -> (i32, i32) {
    %c0_i32 = arith.constant 0 : i32
    %c0_i32_0 = arith.constant 0 : i32
    return %arg0, %c0_i32 : i32, i32
  }
  func.func @transform_1(%arg0: i32, %arg1: memref<1xi32, #tpu.memory_space<smem>>) -> (i32, i32) {
    %c0_i32 = arith.constant 0 : i32
    %c0_i32_0 = arith.constant 0 : i32
    return %arg0, %c0_i32 : i32, i32
  }
  func.func @transform_2(%arg0: i32, %arg1: memref<1xi32, #tpu.memory_space<smem>>) -> (i32, i32) {
    %c0_i32 = arith.constant 0 : i32
    %c0_i32_0 = arith.constant 0 : i32
    %c0_i32_1 = arith.constant 0 : i32
    return %c0_i32, %c0_i32_0 : i32, i32
  }
  func.func @transform_3(%arg0: i32, %arg1: memref<1xi32, #tpu.memory_space<smem>>) -> (i32, i32) {
    %c0_i32 = arith.constant 0 : i32
    %c0_i32_0 = arith.constant 0 : i32
    %c0_i32_1 = arith.constant 0 : i32
    return %c0_i32, %c0_i32_0 : i32, i32
  }
  func.func @transform_4(%arg0: i32, %arg1: memref<1xi32, #tpu.memory_space<smem>>) -> (i32, i32) {
    %c0_i32 = arith.constant 0 : i32
    %c0_i32_0 = arith.constant 0 : i32
    return %arg0, %c0_i32 : i32, i32
  }
  func.func @transform_5(%arg0: i32, %arg1: memref<1xi32, #tpu.memory_space<smem>>) -> (i32, i32) {
    %c0_i32 = arith.constant 0 : i32
    %c0_i32_0 = arith.constant 0 : i32
    return %arg0, %c0_i32 : i32, i32
  }
}

</mosaic_0001>

<bundles_post_ra>
// kernel: _shaping_call.1
= control target key start
LH: loop header
LB: loop body
LE: loop exit
PB: predicated region body
PF: predicated region fallthrough
CT: control target
= control target key end

     0   :  { %v462_v0 = vmov 0.0|0.0   ;;  %vm463_vm0 = vmmov 0   ;;  %v464_v4 = vmov 0.0   ;;  %vm37_vm1 = vcmask 261120   ;;  %s553_s3 = inlined_call_operand.vmem [shape: f32[33,32], index: 3, kind: input, shape index: {}]   ;;  %s554_s1 = inlined_call_operand.vmem [shape: f32[8,32], index: 1, kind: input, shape index: {}]   ;;  %s555_s2 = inlined_call_operand.vmem [shape: f32[8,32], index: 2, kind: input, shape index: {}]   ;;  %s556_s4 = inlined_call_operand.vmem [shape: f32[33,8], index: 4, kind: input, shape index: {}]   ;;  %s557_s0 = inlined_call_operand.<no memory space> [shape: s32[1], index: 0, kind: input, shape index: {}]   ;;  %s558_s5 = inlined_call_operand.vmem [shape: f32[8,1], index: 5, kind: output, shape index: {0}]   ;;  %s559_s6 = inlined_call_operand.vmem [shape: f32[8,1], index: 6, kind: output, shape index: {1}]  }
   0x1   :  { %431 = vmatprep.subr.bf16.mxu0 %v462_v0  ;;  %v21_v1 = vld [vmem:[%s553_s3] sm:$0xff]  ;;  %v22_v2 = vld [vmem:[%s553_s3 + $0x8] sm:$0xff]  ;;  %v23_v3 = vld [vmem:[%s553_s3 + $0x10] sm:$0xff]  ;;  %395 = vmatprep.mubr.msk.f32.mxu0 %vm463_vm0, %v464_v4  ;;  %v189_v25 = vlaneseq  ;;  %v191_v27 = vstv %s557_s0  ;;  %vm194_vm3 = vcmask 64512   ;;  %vm198_vm4 = vcmask 7168  }
   0x2   :  { %v432_v5 = vpack.c.bf16 %v22_v2, %v21_v1  ;;  %v24_v6 = vld [vmem:[%s553_s3 + $0x18] sm:$0xff]  ;;  %437 = vmatprep.subr.bf16.mxu1 %v462_v0  ;;  %406 = vmatprep.mubr.msk.f32.mxu1 %vm463_vm0, %v464_v4  ;;  %v32_v8 = vld [vmem:[%s554_s1] sm:$0xff]  ;;  %v27_v11 = vld [vmem:[%s556_s4 + $0x8] sm:$0xff] }
   0x3   :  { %v435_v7 = vpack.c.bf16 %v24_v6, %v23_v3  ;;  %v200_v9 = vld [vmem:[%s555_s2] sm:$0xff]  ;;  %v28_v13 = vld [vmem:[%s556_s4 + $0x10] sm:$0xff]  ;;  %v29_v14 = vld [vmem:[%s556_s4 + $0x18] sm:$0xff]  ;;  %v190_v26 = vand.u32 127, %v189_v25 }
   0x4   :  { %433 = vmatpush3.bf16.msra.mxu0 %v432_v5  ;;  %v26_v10 = vld [vmem:[%s556_s4] sm:$0xff]  ;;  %v441_v15 = vpack.c.bf16 %v29_v14, %v28_v13 }
   0x5   :  { %434 = vmatprep.subr.bf16.mxu0 %v462_v0  ;;  %v438_v12 = vpack.c.bf16 %v27_v11, %v26_v10  ;;  %v361_v16 = vld [vmem:[%s553_s3 + $0x20] ss:$0 sm:$0xff]  ;;  %vm192_vm2 = vcmp.eq.s32.totalorder %v190_v26, %v191_v27 }
   0x6   :  { %v363_v28 = vld [vmem:[%s556_s4 + $0x20] ss:$0 sm:$0xff] }
   0x7   :  { %439 = vmatpush3.bf16.msra.mxu1 %v438_v12 }
   0x8   :  { %436 = vmatpush3.bf16.msra.mxu0 %v435_v7  ;;  %440 = vmatprep.subr.bf16.mxu1 %v462_v0 }
   0x9   :  { %443 = vmatprep.subr.bf16.mxu0 %v462_v0 }
   0xb   :  { %396 = vmatmul.mubr.msk.f32.vlgmr.msra.gmra.mrb[0].mxu0 %vm37_vm1, %v32_v8  ;;  %442 = vmatpush3.bf16.msra.mxu1 %v441_v15 }
   0xc   :  { %445 = vmatpush3.bf16.msra.mxu0 %v432_v5  ;;  %417 = vmatprep.mubr.msk.f32.mxu0 %vm463_vm0, %v464_v4 }
   0xd   :  { %446 = vmatprep.subr.bf16.mxu0 %v462_v0  ;;  %449 = vmatprep.subr.bf16.mxu1 %v462_v0 }
  0x10   :  { %448 = vmatpush3.bf16.msra.mxu0 %v435_v7 }
  0x13   :  { %418 = vmatmul.mubr.msk.f32.vlgmr.msra.gmra.mrb[2].mxu0 %vm37_vm1, %v200_v9 }
  0xde   :  { %v107_v17 = vpop.f32.mrb[0].mxu0 }
  0xdf   :  { %v108_v18 = vadd.f32 %v361_v16, %v107_v17  ;;  %v397_v19 = vpop.f32.mrb[1].mxu0 }
  0xe1   :  { %458 = vtanh.f32 %v108_v18 }
  0xe6   :  { %v270_v20 = vpop.f32.mrb[2].mxu0 }
  0xe7   :  { %v271_v21 = vadd.f32 %v361_v16, %v270_v20  ;;  %v419_v22 = vpop.f32.mrb[3].mxu0 }
  0xe9   :  { %460 = vtanh.f32 %v271_v21 }
  0xeb   :  { %v459_v23 = vpop.eup %458 }
  0xec   :  { %407 = vmatmul.mubr.msk.f32.vlgmr.msra.gmra.mrb[0].mxu1 %vm37_vm1, %v459_v23 }
  0xed   :  { %451 = vmatpush3.bf16.msra.mxu1 %v438_v12  ;;  %428 = vmatprep.mubr.msk.f32.mxu1 %vm463_vm0, %v464_v4 }
  0xee   :  { %452 = vmatprep.subr.bf16.mxu1 %v462_v0 }
  0xf1   :  { %454 = vmatpush3.bf16.msra.mxu1 %v441_v15 }
  0xf3   :  { %v461_v24 = vpop.eup %460 }
  0xf4   :  { %429 = vmatmul.mubr.msk.f32.vlgmr.msra.gmra.mrb[2].mxu1 %vm37_vm1, %v461_v24 }
 0x1bf   :  { %v185_v29 = vpop.f32.mrb[0].mxu1 }
 0x1c0   :  { %v186_v30 = vadd.f32 %v363_v28, %v185_v29  ;;  %v408_v31 = vpop.f32.mrb[1].mxu1 }
 0x1c2   :  { %v193_v32 = vsel %vm192_vm2, %v186_v30, 0.0 }
 0x1c3   :  { %v195_v33 = vsel %vm194_vm3, %v193_v32, 0.0 }
 0x1c4   :  { %196 = vadd.xlane.f32.xlu0 %v195_v33 }
 0x1c7   :  { %v344_v34 = vpop.f32.mrb[2].mxu1 }
 0x1c8   :  { %v345_v35 = vadd.f32 %v363_v28, %v344_v34  ;;  %v430_v36 = vpop.f32.mrb[3].mxu1 }
 0x1ca   :  { %v348_v37 = vsel %vm192_vm2, %v345_v35, 0.0 }
 0x1cb   :  { %v349_v38 = vsel %vm194_vm3, %v348_v37, 0.0 }
 0x1cc   :  { %350 = vadd.xlane.f32.xlu0 %v349_v38 }
 0x251   :  { %v197_v39 = vpop.xlane.xlu0 %196 }
 0x252   :  { %199 = vst.msk [vmem:[%s558_s5] sm:$0xff] %vm198_vm4, %v197_v39 }
 0x259   :  { %v351_v40 = vpop.xlane.xlu0 %350 }
 0x25a   :  { %352 = vst.msk [vmem:[%s559_s6] sm:$0xff] %vm198_vm4, %v351_v40 }

</bundles_post_ra>
